<compile_context>
chip_gen: v6e
topology: v6e:2x2x1
jax: 0.10.0
libtpu: 0.0.40
codegen_flags: <defaults>
</compile_context>

<pallas_src>
import numpy as np
import jax
import jax.numpy as jnp
from jax.experimental import pallas as pl
from jax.experimental.pallas import tpu as pltpu


_BIG = 1e30


# --------------------------------------------------------------------------------------
# Fused kernel (one grid step == one batch element)
# --------------------------------------------------------------------------------------
def fused_gnn_minsum_kernel(feat_ref, emb_ref, adj_ref, w_ref, p_ref, gat_ref, ms_ref,
                            upd_ref, llr_ref, c2v_ref):
    f32 = jnp.float32
    bf16 = jnp.bfloat16
    M, H = feat_ref.shape
    J = gat_ref.shape[0]

    p = p_ref[...]                                       # (8, H) packed small params
    b1 = p[0:1, :]
    b3 = p[1:2, :]
    b24 = p[2:3, :]                                      # b2 + b4 (fused)
    wp_row = p[3:4, :]
    bp = p[4:5, 0:1]                                     # scalar bias, broadcast over lanes

    # ---- neural message update (MessageGNNLayer.forward) -----------------------------
    # f32 add (v5e-safe), bf16 MXU operand.
    xb = (feat_ref[...].astype(f32) + emb_ref[...].astype(f32)).astype(bf16)   # (M, H)

    # adjacency aggregation: plain 2-D matmuls, adjacencies resident, never broadcast.
    v2c = jnp.dot(adj_ref[0], xb, preferred_element_type=f32)                  # (M, H)
    c2v = jnp.dot(adj_ref[1], xb, preferred_element_type=f32)                  # (M, H)

    # merged 2-layer MLPs: three (M,2H)x(2H,H) matmuls instead of six (M,H)x(H,H).
    in1 = jnp.concatenate([xb, v2c.astype(bf16)], axis=1)                      # (M, 2H)
    in2 = jnp.concatenate([xb, c2v.astype(bf16)], axis=1)                      # (M, 2H)
    h1 = jnp.maximum(jnp.dot(in1, w_ref[0], preferred_element_type=f32) + b1, 0.0)
    h2 = jnp.maximum(jnp.dot(in2, w_ref[1], preferred_element_type=f32) + b3, 0.0)
    hc = jnp.concatenate([h1.astype(bf16), h2.astype(bf16)], axis=1)           # (M, 2H)
    upd = jnp.dot(hc, w_ref[2], preferred_element_type=f32) + b24              # (M, H) f32
    upd_ref[...] = upd                                   # 2-D view write, no reshape

    # ---- output projection -> lane-dense (1, M) llr, kept in VMEM --------------------
    llr = jax.lax.dot_general(wp_row.astype(bf16), upd.astype(bf16),
                              (((1,), (1,)), ((), ())),
                              preferred_element_type=f32) + bp                 # (1, M)
    llr_ref[...] = llr

    # ---- fused min-sum check update (check_layer_update) -----------------------------
    # hi/lo split so the bf16 one-hot gather reproduces the f32 llr (no f32 MXU pass).
    llr_hi = llr.astype(bf16)
    llr_lo = (llr - llr_hi.astype(f32)).astype(bf16)
    llr_hl = jnp.concatenate([llr_hi, llr_lo], axis=0)                         # (2, M)

    ms = ms_ref[...]                                     # (J+1, M): rows 0..J-1 excl-BIG,
    min_mag = jnp.full((1, M), _BIG, f32)                #           row J = (cnt>0) mask
    parity = jnp.zeros((1, M), jnp.int32)
    has_zero = jnp.zeros((1, M), jnp.int32)
    for j in range(J):                                   # small static unrolled loop
        g2 = jnp.dot(llr_hl, gat_ref[j], preferred_element_type=f32)           # (2, M)
        gj = jnp.sum(g2, axis=0, keepdims=True)          # (1, M) == llr[idx[:, j]] (0 if excluded)
        excl_big = ms[j:j + 1, :]                        # 0 where included, BIG otherwise
        incl = excl_big == 0.0
        min_mag = jnp.minimum(min_mag, jnp.abs(gj) + excl_big)
        parity = parity ^ (gj < 0.0).astype(jnp.int32)   # excluded entries are exactly 0
        has_zero = has_zero | ((gj == 0.0) & incl).astype(jnp.int32)
    sign = jnp.where(has_zero > 0, 0.0, 1.0 - 2.0 * parity.astype(f32))
    c2v_ref[...] = sign * min_mag * ms[J:J + 1, :]


# --------------------------------------------------------------------------------------
# Wrapper
# --------------------------------------------------------------------------------------
def custom_check_message_gnn_forward(message_features, message_types, packed,
                                     minsum_tables):
    """Fused forward: neural message update + output projection + min-sum check update."""
    emb, adj, w_pk, p_pk = packed
    gat, msum = minsum_tables
    B, M, H = message_features.shape
    J = gat.shape[0]

    safe_types = jnp.clip(message_types, 0, emb.shape[0] - 1)
    emb_g = emb[safe_types].astype(jnp.bfloat16)         # (M, H) gathered type embeddings
    feat = message_features.astype(jnp.bfloat16)         # halve the dominant HBM read

    const2 = lambda b: (0, 0)
    const3 = lambda b: (0, 0, 0)
    in_specs = [
        pl.BlockSpec((None, M, H), lambda b: (b, 0, 0)),   # features, streamed per batch
        pl.BlockSpec((M, H), const2),                      # type embeddings (resident)
        pl.BlockSpec((2, M, M), const3),                   # packed adjacencies (resident)
        pl.BlockSpec((3, 2 * H, H), const3),               # packed merged MLP weights
        pl.BlockSpec((8, H), const2),                      # packed biases / wp / bp
        pl.BlockSpec((J, M, M), const3),                   # bf16 one-hot gather tables
        pl.BlockSpec((J + 1, M), const2),                  # excl-BIG masks + cnt mask
    ]
    out_specs = (
        pl.BlockSpec((None, M, H), lambda b: (b, 0, 0)),
        pl.BlockSpec((None, 1, M), lambda b: (b, 0, 0)),
        pl.BlockSpec((None, 1, M), lambda b: (b, 0, 0)),
    )
    out_shape = (jax.ShapeDtypeStruct((B, M, H), jnp.float32),
                 jax.ShapeDtypeStruct((B, 1, M), jnp.float32),
                 jax.ShapeDtypeStruct((B, 1, M), jnp.float32))

    upd, llr3, c2v3 = pl.pallas_call(
        fused_gnn_minsum_kernel,
        grid=(B,),
        in_specs=in_specs,
        out_specs=out_specs,
        out_shape=out_shape,
        compiler_params=pltpu.CompilerParams(
            dimension_semantics=("parallel",),
            # <= ~48 MiB so the same kernel also fits v7x's 64 MiB VMEM; raise toward
            # ~96 MiB on v5e/v6e if larger resident slabs are wanted.
            vmem_limit_bytes=48 * 1024 * 1024),
    )(feat, emb_g, adj, w_pk, p_pk, gat, msum)
    return upd, llr3[:, 0, :], c2v3[:, 0, :]


# --------------------------------------------------------------------------------------
# Parameter init and one-time host-side packing / min-sum table construction
# --------------------------------------------------------------------------------------
def init_params(key, num_message_types, hidden):
    ks = jax.random.split(key, 13)
    h = hidden
    emb = jax.random.normal(ks[0], (num_message_types, h), jnp.float32)
    s2 = 1.0 / np.sqrt(2 * h)
    s1 = 1.0 / np.sqrt(h)
    w1a = jax.random.uniform(ks[1], (h, h), jnp.float32, -s2, s2)
    w1b = jax.random.uniform(ks[2], (h, h), jnp.float32, -s2, s2)
    b1 = jax.random.uniform(ks[3], (1, h), jnp.float32, -s2, s2)
    w2 = jax.random.uniform(ks[4], (h, h), jnp.float32, -s1, s1)
    b2 = jax.random.uniform(ks[5], (1, h), jnp.float32, -s1, s1)
    w3a = jax.random.uniform(ks[6], (h, h), jnp.float32, -s2, s2)
    w3b = jax.random.uniform(ks[7], (h, h), jnp.float32, -s2, s2)
    b3 = jax.random.uniform(ks[8], (1, h), jnp.float32, -s2, s2)
    w4 = jax.random.uniform(ks[9], (h, h), jnp.float32, -s1, s1)
    b4 = jax.random.uniform(ks[10], (1, h), jnp.float32, -s1, s1)
    wp = jax.random.uniform(ks[11], (1, h), jnp.float32, -s1, s1)
    bp = jax.random.uniform(ks[12], (1, 1), jnp.float32, -s1, s1)
    alpha = jnp.float32(0.8)  # declared in __init__, unused in the shown forward
    mlp_params = (w1a, w1b, b1, w2, b2, w3a, w3b, b3, w4, b4, wp, bp)
    return emb, mlp_params, alpha


def pack_layer_params(var_to_check_adj, check_to_var_adj, emb, mlp_params):
    """Layer-dependent only; pack once and reuse across forward calls."""
    (w1a, w1b, b1, w2, b2, w3a, w3b, b3, w4, b4, wp, bp) = mlp_params
    H = w1a.shape[0]
    bf16 = jnp.bfloat16
    adj = jnp.stack([var_to_check_adj, check_to_var_adj], axis=0).astype(bf16)   # (2,M,M)
    w_pk = jnp.stack([jnp.concatenate([w1a, w1b], axis=0),
                      jnp.concatenate([w3a, w3b], axis=0),
                      jnp.concatenate([w2, w4], axis=0)], axis=0).astype(bf16)   # (3,2H,H)
    p = jnp.zeros((8, H), jnp.float32)
    p = p.at[0].set(b1[0]).at[1].set(b3[0]).at[2].set(b2[0] + b4[0]).at[3].set(wp[0])
    p = p.at[4, 0].set(bp[0, 0])                                                 # (8, H)
    return (emb.astype(jnp.float32), adj, w_pk, p)


def build_minsum_tables(check_index_tensor, num_messages):
    """Graph-dependent only; build once on the host and reuse across forward calls."""
    cit = np.asarray(check_index_tensor)
    M, D = cit.shape
    J = D - 1
    idx = cit[:, 1:]                                     # (M, J) incoming msg indices
    valid = idx >= 0
    has_any = valid.any(axis=1)
    last_pos = np.where(has_any, (J - 1) - np.argmax(valid[:, ::-1], axis=1), -1)
    include = valid & (np.arange(J)[None, :] != last_pos[:, None])   # drop last valid entry
    cnt = include.sum(axis=1)
    # (J, M, M) bf16 one-hot gather: gat[j, n, m] = 1 iff include[m, j] and idx[m, j] == n
    gat = np.zeros((J, num_messages, M), np.float32)
    mm = np.arange(M)
    for j in range(J):
        inc = include[:, j]
        gat[j, idx[inc, j], mm[inc]] = 1.0
    # (J+1, M): rows 0..J-1 additive-BIG exclusion masks, row J = (cnt>0) multiplier
    msum = np.zeros((J + 1, M), np.float32)
    msum[:J] = np.where(include.T, 0.0, _BIG)
    msum[J] = (cnt > 0).astype(np.float32)
    return jnp.asarray(gat, jnp.bfloat16), jnp.asarray(msum)


# --------------------------------------------------------------------------------------
# Numpy reference (literal translation of the PyTorch code, with the kernel's bf16
# MXU-operand rounding mirrored so it can be compared at a tight tolerance)
# --------------------------------------------------------------------------------------
def reference(message_features, message_types, av, ac, cit, emb, mlp_params):
    def r(x):  # round-to-bfloat16-and-back, exactly as the kernel does for MXU operands
        return np.asarray(jnp.asarray(np.asarray(x, np.float32)).astype(jnp.bfloat16)
                          .astype(jnp.float32))

    (w1a, w1b, b1, w2, b2, w3a, w3b, b3, w4, b4, wp, bp) = \
        [np.asarray(p, np.float32) for p in mlp_params]
    emb = np.asarray(emb, np.float32)
    feat = np.asarray(message_features, np.float32)
    types = np.clip(np.asarray(message_types), 0, emb.shape[0] - 1)
    B, M, H = feat.shape

    xb = r(r(feat) + r(emb[types])[None])
    av_b, ac_b = r(np.asarray(av, np.float32)), r(np.asarray(ac, np.float32))
    W1 = np.concatenate([r(w1a), r(w1b)], axis=0)
    W3 = np.concatenate([r(w3a), r(w3b)], axis=0)
    W24 = np.concatenate([r(w2), r(w4)], axis=0)

    upd = np.zeros((B, M, H), np.float32)
    llr = np.zeros((B, M), np.float32)
    for b in range(B):
        x = xb[b]
        v2c = (av_b @ x).astype(np.float32)
        c2v = (ac_b @ x).astype(np.float32)
        in1 = np.concatenate([x, r(v2c)], axis=1)
        in2 = np.concatenate([x, r(c2v)], axis=1)
        h1 = np.maximum(in1 @ W1 + b1, 0.0)
        h2 = np.maximum(in2 @ W3 + b3, 0.0)
        hc = np.concatenate([r(h1), r(h2)], axis=1)
        u = (hc @ W24 + (b2 + b4)).astype(np.float32)
        upd[b] = u
        llr[b] = (r(u) @ r(wp)[0] + bp[0, 0]).astype(np.float32)

    cit = np.asarray(cit)
    out = np.zeros((B, M), dtype=np.float32)
    for m in range(M):
        vi = cit[m, 1:][cit[m, 1:] >= 0]
        if len(vi) >= 2:                                 # only the last loop iteration of
            sel = llr[:, vi[:-1]]                        # the torch code survives
            out[:, m] = np.prod(np.sign(sel), axis=1) * np.min(np.abs(sel), axis=1)
    return upd, llr, out


# --------------------------------------------------------------------------------------
if __name__ == "__main__":
    B, M, H = 2, 16, 32
    NUM_TYPES = 4
    MAX_DEG = 6  # check_index_tensor: (M, MAX_DEG); col 0 = check idx, cols 1.. = incoming msgs

    key = jax.random.PRNGKey(0)
    k_feat, k_types, k_av, k_ac, k_par = jax.random.split(key, 5)

    message_features = jax.random.normal(k_feat, (B, M, H), jnp.float32)
    message_types = jax.random.randint(k_types, (M,), 0, NUM_TYPES, jnp.int32)
    var_to_check_adj = (jax.random.uniform(k_av, (M, M)) > 0.7).astype(jnp.float32)
    check_to_var_adj = (jax.random.uniform(k_ac, (M, M)) > 0.7).astype(jnp.float32)

    # check index tensor: 4 checks x 4 messages; each message lists the other members of its check.
    cit = np.full((M, MAX_DEG), -1, dtype=np.int32)
    for m in range(M):
        c = m // 4
        members = [x for x in range(4 * c, 4 * c + 4) if x != m]
        cit[m, 0] = c
        cit[m, 1:1 + len(members)] = members
    cit[14, 1:] = -1                       # zero valid entries -> output 0
    cit[15, 1:] = [13, -1, -1, -1, -1]     # single valid entry -> output 0

    emb, mlp_params, alpha = init_params(k_par, NUM_TYPES, H)

    # one-time host precompute: min-sum gather tables + packed layer parameters
    minsum_tables = build_minsum_tables(cit, M)
    packed = pack_layer_params(var_to_check_adj, check_to_var_adj, emb, mlp_params)

    fwd = jax.jit(custom_check_message_gnn_forward)
    upd, llr, c2v = fwd(message_features, message_types, packed, minsum_tables)
    jax.block_until_ready((upd, llr, c2v))

    # verify the neural update + projection against the (bf16-mirrored) numpy reference
    upd_r, llr_r, _ = reference(message_features, message_types, var_to_check_adj,
                                check_to_var_adj, cit, emb, mlp_params)
    np.testing.assert_allclose(np.asarray(upd), upd_r, rtol=1e-2, atol=1e-2)
    np.testing.assert_allclose(np.asarray(llr), llr_r, rtol=1e-2, atol=1e-2)

    # min-sum stage checked on the kernel's own llr (avoids cascading fp tie-breaks)
    llr_np = np.asarray(llr)
    out_chk = np.zeros((B, M), dtype=np.float32)
    for m in range(M):
        vi = cit[m, 1:][cit[m, 1:] >= 0]
        if len(vi) >= 2:
            sel = llr_np[:, vi[:-1]]
            out_chk[:, m] = np.prod(np.sign(sel), axis=1) * np.min(np.abs(sel), axis=1)
    np.testing.assert_allclose(np.asarray(c2v), out_chk, rtol=1e-3, atol=1e-3)

    print("KERNEL_OK")
</pallas_src>

<mosaic_0001>
module attributes {stable_mosaic.version = 11 : i64} {
  func.func @fused_gnn_minsum_kernel(%arg0: i32, %arg1: memref<1x16x32xbf16, #tpu.memory_space<vmem>>, %arg2: memref<16x32xbf16, #tpu.memory_space<vmem>>, %arg3: memref<2x16x16xbf16, #tpu.memory_space<vmem>>, %arg4: memref<3x64x32xbf16, #tpu.memory_space<vmem>>, %arg5: memref<8x32xf32, #tpu.memory_space<vmem>>, %arg6: memref<5x16x16xbf16, #tpu.memory_space<vmem>>, %arg7: memref<6x16xf32, #tpu.memory_space<vmem>>, %arg8: memref<1x16x32xf32, #tpu.memory_space<vmem>>, %arg9: memref<1x1x16xf32, #tpu.memory_space<vmem>>, %arg10: memref<1x1x16xf32, #tpu.memory_space<vmem>>) attributes {dimension_semantics = [#tpu.dimension_semantics<parallel>], iteration_bounds = array<i64: 2>, scalar_prefetch = 0 : i64, scratch_operands = 0 : i64, tpu.core_type = #tpu.core_type<tc>, window_params = [{transform_indices = @transform_0, window_bounds = array<i64: 1, 16, 32>}, {pipeline_mode = #tpu.pipeline_mode<synchronous>, transform_indices = @transform_1, window_bounds = array<i64: 16, 32>}, {pipeline_mode = #tpu.pipeline_mode<synchronous>, transform_indices = @transform_2, window_bounds = array<i64: 2, 16, 16>}, {pipeline_mode = #tpu.pipeline_mode<synchronous>, transform_indices = @transform_3, window_bounds = array<i64: 3, 64, 32>}, {pipeline_mode = #tpu.pipeline_mode<synchronous>, transform_indices = @transform_4, window_bounds = array<i64: 8, 32>}, {pipeline_mode = #tpu.pipeline_mode<synchronous>, transform_indices = @transform_5, window_bounds = array<i64: 5, 16, 16>}, {pipeline_mode = #tpu.pipeline_mode<synchronous>, transform_indices = @transform_6, window_bounds = array<i64: 6, 16>}, {transform_indices = @transform_7, window_bounds = array<i64: 1, 16, 32>}, {transform_indices = @transform_8, window_bounds = array<i64: 1, 1, 16>}, {transform_indices = @transform_9, window_bounds = array<i64: 1, 1, 16>}]} {
    %c0 = arith.constant 0 : index
    %c0_0 = arith.constant 0 : index
    %0 = vector.load %arg5[%c0, %c0_0] : memref<8x32xf32, #tpu.memory_space<vmem>>, vector<8x32xf32>
    %1 = vector.extract_strided_slice %0 {offsets = [0, 0], sizes = [1, 32], strides = [1, 1]} : vector<8x32xf32> to vector<1x32xf32>
    %2 = vector.extract_strided_slice %0 {offsets = [1, 0], sizes = [1, 32], strides = [1, 1]} : vector<8x32xf32> to vector<1x32xf32>
    %3 = vector.extract_strided_slice %0 {offsets = [2, 0], sizes = [1, 32], strides = [1, 1]} : vector<8x32xf32> to vector<1x32xf32>
    %4 = vector.extract_strided_slice %0 {offsets = [3, 0], sizes = [1, 32], strides = [1, 1]} : vector<8x32xf32> to vector<1x32xf32>
    %5 = vector.extract_strided_slice %0 {offsets = [4, 0], sizes = [1, 1], strides = [1, 1]} : vector<8x32xf32> to vector<1x1xf32>
    %c0_1 = arith.constant 0 : index
    %c0_2 = arith.constant 0 : index
    %c0_3 = arith.constant 0 : index
    %6 = vector.load %arg1[%c0_1, %c0_2, %c0_3] : memref<1x16x32xbf16, #tpu.memory_space<vmem>>, vector<1x16x32xbf16>
    %7 = vector.shape_cast %6 : vector<1x16x32xbf16> to vector<16x32xbf16>
    %8 = arith.extf %7 : vector<16x32xbf16> to vector<16x32xf32>
    %c0_4 = arith.constant 0 : index
    %c0_5 = arith.constant 0 : index
    %9 = vector.load %arg2[%c0_4, %c0_5] : memref<16x32xbf16, #tpu.memory_space<vmem>>, vector<16x32xbf16>
    %10 = arith.extf %9 : vector<16x32xbf16> to vector<16x32xf32>
    %11 = arith.addf %8, %10 : vector<16x32xf32>
    %12 = arith.truncf %11 : vector<16x32xf32> to vector<16x32xbf16>
    %c0_6 = arith.constant 0 : index
    %c0_7 = arith.constant 0 : index
    %c0_8 = arith.constant 0 : index
    %13 = vector.load %arg3[%c0_6, %c0_7, %c0_8] : memref<2x16x16xbf16, #tpu.memory_space<vmem>>, vector<1x16x16xbf16>
    %14 = vector.shape_cast %13 : vector<1x16x16xbf16> to vector<16x16xbf16>
    %cst = arith.constant dense<0.000000e+00> : vector<16x32xf32>
    %15 = tpu.matmul %14, %12, %cst {dimension_numbers = #tpu.dot_dimension_numbers<[1], [0], [0], [1], [0, 0, 1, 1], [], []>} : vector<16x16xbf16>, vector<16x32xbf16>, vector<16x32xf32> -> vector<16x32xf32>
    %c1 = arith.constant 1 : index
    %c0_9 = arith.constant 0 : index
    %c0_10 = arith.constant 0 : index
    %16 = vector.load %arg3[%c1, %c0_9, %c0_10] : memref<2x16x16xbf16, #tpu.memory_space<vmem>>, vector<1x16x16xbf16>
    %17 = vector.shape_cast %16 : vector<1x16x16xbf16> to vector<16x16xbf16>
    %cst_11 = arith.constant dense<0.000000e+00> : vector<16x32xf32>
    %18 = tpu.matmul %17, %12, %cst_11 {dimension_numbers = #tpu.dot_dimension_numbers<[1], [0], [0], [1], [0, 0, 1, 1], [], []>} : vector<16x16xbf16>, vector<16x32xbf16>, vector<16x32xf32> -> vector<16x32xf32>
    %19 = arith.truncf %15 : vector<16x32xf32> to vector<16x32xbf16>
    %20 = tpu.concatenate %12, %19 in 1 : vector<16x32xbf16>, vector<16x32xbf16> -> vector<16x64xbf16>
    %21 = arith.truncf %18 : vector<16x32xf32> to vector<16x32xbf16>
    %22 = tpu.concatenate %12, %21 in 1 : vector<16x32xbf16>, vector<16x32xbf16> -> vector<16x64xbf16>
    %c0_12 = arith.constant 0 : index
    %c0_13 = arith.constant 0 : index
    %c0_14 = arith.constant 0 : index
    %23 = vector.load %arg4[%c0_12, %c0_13, %c0_14] : memref<3x64x32xbf16, #tpu.memory_space<vmem>>, vector<1x64x32xbf16>
    %24 = vector.shape_cast %23 : vector<1x64x32xbf16> to vector<64x32xbf16>
    %cst_15 = arith.constant dense<0.000000e+00> : vector<16x32xf32>
    %25 = tpu.matmul %20, %24, %cst_15 {dimension_numbers = #tpu.dot_dimension_numbers<[1], [0], [0], [1], [0, 0, 1, 1], [], []>} : vector<16x64xbf16>, vector<64x32xbf16>, vector<16x32xf32> -> vector<16x32xf32>
    %26 = vector.broadcast %1 : vector<1x32xf32> to vector<16x32xf32>
    %27 = arith.addf %25, %26 : vector<16x32xf32>
    %cst_16 = arith.constant 0.000000e+00 : f32
    %28 = vector.broadcast %cst_16 : f32 to vector<16x32xf32>
    %29 = arith.maximumf %27, %28 : vector<16x32xf32>
    %c1_17 = arith.constant 1 : index
    %c0_18 = arith.constant 0 : index
    %c0_19 = arith.constant 0 : index
    %30 = vector.load %arg4[%c1_17, %c0_18, %c0_19] : memref<3x64x32xbf16, #tpu.memory_space<vmem>>, vector<1x64x32xbf16>
    %31 = vector.shape_cast %30 : vector<1x64x32xbf16> to vector<64x32xbf16>
    %cst_20 = arith.constant dense<0.000000e+00> : vector<16x32xf32>
    %32 = tpu.matmul %22, %31, %cst_20 {dimension_numbers = #tpu.dot_dimension_numbers<[1], [0], [0], [1], [0, 0, 1, 1], [], []>} : vector<16x64xbf16>, vector<64x32xbf16>, vector<16x32xf32> -> vector<16x32xf32>
    %33 = vector.broadcast %2 : vector<1x32xf32> to vector<16x32xf32>
    %34 = arith.addf %32, %33 : vector<16x32xf32>
    %cst_21 = arith.constant 0.000000e+00 : f32
    %35 = vector.broadcast %cst_21 : f32 to vector<16x32xf32>
    %36 = arith.maximumf %34, %35 : vector<16x32xf32>
    %37 = arith.truncf %29 : vector<16x32xf32> to vector<16x32xbf16>
    %38 = arith.truncf %36 : vector<16x32xf32> to vector<16x32xbf16>
    %39 = tpu.concatenate %37, %38 in 1 : vector<16x32xbf16>, vector<16x32xbf16> -> vector<16x64xbf16>
    %c2 = arith.constant 2 : index
    %c0_22 = arith.constant 0 : index
    %c0_23 = arith.constant 0 : index
    %40 = vector.load %arg4[%c2, %c0_22, %c0_23] : memref<3x64x32xbf16, #tpu.memory_space<vmem>>, vector<1x64x32xbf16>
    %41 = vector.shape_cast %40 : vector<1x64x32xbf16> to vector<64x32xbf16>
    %cst_24 = arith.constant dense<0.000000e+00> : vector<16x32xf32>
    %42 = tpu.matmul %39, %41, %cst_24 {dimension_numbers = #tpu.dot_dimension_numbers<[1], [0], [0], [1], [0, 0, 1, 1], [], []>} : vector<16x64xbf16>, vector<64x32xbf16>, vector<16x32xf32> -> vector<16x32xf32>
    %43 = vector.broadcast %3 : vector<1x32xf32> to vector<16x32xf32>
    %44 = arith.addf %42, %43 : vector<16x32xf32>
    %c0_25 = arith.constant 0 : index
    %c0_26 = arith.constant 0 : index
    %c0_27 = arith.constant 0 : index
    %45 = vector.load %arg8[%c0_25, %c0_26, %c0_27] : memref<1x16x32xf32, #tpu.memory_space<vmem>>, vector<1x16x32xf32>
    %46 = vector.shape_cast %45 : vector<1x16x32xf32> to vector<16x32xf32>
    %47 = vector.shape_cast %44 : vector<16x32xf32> to vector<1x16x32xf32>
    tpu.vector_store %arg8[%c0_25, %c0_26, %c0_27], %47 {strides = array<i32>} : memref<1x16x32xf32, #tpu.memory_space<vmem>>, vector<1x16x32xf32>,
    %48 = arith.truncf %4 : vector<1x32xf32> to vector<1x32xbf16>
    %49 = arith.truncf %44 : vector<16x32xf32> to vector<16x32xbf16>
    %cst_28 = arith.constant dense<0.000000e+00> : vector<1x16xf32>
    %50 = tpu.matmul %48, %49, %cst_28 {dimension_numbers = #tpu.dot_dimension_numbers<[1], [1], [0], [0], [0, 0, 1, 0], [], []>} : vector<1x32xbf16>, vector<16x32xbf16>, vector<1x16xf32> -> vector<1x16xf32>
    %51 = vector.broadcast %5 : vector<1x1xf32> to vector<1x16xf32>
    %52 = arith.addf %50, %51 : vector<1x16xf32>
    %c0_29 = arith.constant 0 : index
    %c0_30 = arith.constant 0 : index
    %c0_31 = arith.constant 0 : index
    %53 = vector.load %arg9[%c0_29, %c0_30, %c0_31] : memref<1x1x16xf32, #tpu.memory_space<vmem>>, vector<1x1x16xf32>
    %54 = vector.shape_cast %53 : vector<1x1x16xf32> to vector<1x16xf32>
    %55 = vector.shape_cast %52 : vector<1x16xf32> to vector<1x1x16xf32>
    tpu.vector_store %arg9[%c0_29, %c0_30, %c0_31], %55 {strides = array<i32>} : memref<1x1x16xf32, #tpu.memory_space<vmem>>, vector<1x1x16xf32>,
    %56 = arith.truncf %52 : vector<1x16xf32> to vector<1x16xbf16>
    %57 = arith.extf %56 : vector<1x16xbf16> to vector<1x16xf32>
    %58 = arith.subf %52, %57 : vector<1x16xf32>
    %59 = arith.truncf %58 : vector<1x16xf32> to vector<1x16xbf16>
    %60 = tpu.concatenate %56, %59 in 0 : vector<1x16xbf16>, vector<1x16xbf16> -> vector<2x16xbf16>
    %c0_32 = arith.constant 0 : index
    %c0_33 = arith.constant 0 : index
    %61 = vector.load %arg7[%c0_32, %c0_33] : memref<6x16xf32, #tpu.memory_space<vmem>>, vector<6x16xf32>
    %cst_34 = arith.constant 1.000000e+30 : f32
    %62 = vector.broadcast %cst_34 : f32 to vector<1x16xf32>
    %c0_i32 = arith.constant 0 : i32
    %63 = vector.broadcast %c0_i32 : i32 to vector<1x16xi32>
    %c0_i32_35 = arith.constant 0 : i32
    %64 = vector.broadcast %c0_i32_35 : i32 to vector<1x16xi32>
    %c0_36 = arith.constant 0 : index
    %c0_37 = arith.constant 0 : index
    %c0_38 = arith.constant 0 : index
    %65 = vector.load %arg6[%c0_36, %c0_37, %c0_38] : memref<5x16x16xbf16, #tpu.memory_space<vmem>>, vector<1x16x16xbf16>
    %66 = vector.shape_cast %65 : vector<1x16x16xbf16> to vector<16x16xbf16>
    %cst_39 = arith.constant dense<0.000000e+00> : vector<2x16xf32>
    %67 = tpu.matmul %60, %66, %cst_39 {dimension_numbers = #tpu.dot_dimension_numbers<[1], [0], [0], [1], [0, 0, 1, 1], [], []>} : vector<2x16xbf16>, vector<16x16xbf16>, vector<2x16xf32> -> vector<2x16xf32>
    %cst_40 = arith.constant dense<0.000000e+00> : vector<16xf32>
    %68 = vector.multi_reduction <add>, %67, %cst_40 [0] : vector<2x16xf32> to vector<16xf32>
    %69 = vector.shape_cast %68 : vector<16xf32> to vector<1x16xf32>
    %70 = vector.extract_strided_slice %61 {offsets = [0, 0], sizes = [1, 16], strides = [1, 1]} : vector<6x16xf32> to vector<1x16xf32>
    %cst_41 = arith.constant 0.000000e+00 : f32
    %71 = vector.broadcast %cst_41 : f32 to vector<1x16xf32>
    %72 = arith.cmpf oeq, %70, %71 : vector<1x16xf32>
    %73 = math.absf %69 : vector<1x16xf32>
    %74 = arith.addf %73, %70 : vector<1x16xf32>
    %75 = arith.minimumf %62, %74 : vector<1x16xf32>
    %cst_42 = arith.constant 0.000000e+00 : f32
    %76 = vector.broadcast %cst_42 : f32 to vector<1x16xf32>
    %77 = arith.cmpf olt, %69, %76 : vector<1x16xf32>
    %78 = arith.extui %77 : vector<1x16xi1> to vector<1x16xi32>
    %79 = arith.xori %63, %78 : vector<1x16xi32>
    %cst_43 = arith.constant 0.000000e+00 : f32
    %80 = vector.broadcast %cst_43 : f32 to vector<1x16xf32>
    %81 = arith.cmpf oeq, %69, %80 : vector<1x16xf32>
    %82 = arith.andi %81, %72 : vector<1x16xi1>
    %83 = arith.extui %82 : vector<1x16xi1> to vector<1x16xi32>
    %84 = arith.ori %64, %83 : vector<1x16xi32>
    %c1_44 = arith.constant 1 : index
    %c0_45 = arith.constant 0 : index
    %c0_46 = arith.constant 0 : index
    %85 = vector.load %arg6[%c1_44, %c0_45, %c0_46] : memref<5x16x16xbf16, #tpu.memory_space<vmem>>, vector<1x16x16xbf16>
    %86 = vector.shape_cast %85 : vector<1x16x16xbf16> to vector<16x16xbf16>
    %cst_47 = arith.constant dense<0.000000e+00> : vector<2x16xf32>
    %87 = tpu.matmul %60, %86, %cst_47 {dimension_numbers = #tpu.dot_dimension_numbers<[1], [0], [0], [1], [0, 0, 1, 1], [], []>} : vector<2x16xbf16>, vector<16x16xbf16>, vector<2x16xf32> -> vector<2x16xf32>
    %cst_48 = arith.constant dense<0.000000e+00> : vector<16xf32>
    %88 = vector.multi_reduction <add>, %87, %cst_48 [0] : vector<2x16xf32> to vector<16xf32>
    %89 = vector.shape_cast %88 : vector<16xf32> to vector<1x16xf32>
    %90 = vector.extract_strided_slice %61 {offsets = [1, 0], sizes = [1, 16], strides = [1, 1]} : vector<6x16xf32> to vector<1x16xf32>
    %cst_49 = arith.constant 0.000000e+00 : f32
    %91 = vector.broadcast %cst_49 : f32 to vector<1x16xf32>
    %92 = arith.cmpf oeq, %90, %91 : vector<1x16xf32>
    %93 = math.absf %89 : vector<1x16xf32>
    %94 = arith.addf %93, %90 : vector<1x16xf32>
    %95 = arith.minimumf %75, %94 : vector<1x16xf32>
    %cst_50 = arith.constant 0.000000e+00 : f32
    %96 = vector.broadcast %cst_50 : f32 to vector<1x16xf32>
    %97 = arith.cmpf olt, %89, %96 : vector<1x16xf32>
    %98 = arith.extui %97 : vector<1x16xi1> to vector<1x16xi32>
    %99 = arith.xori %79, %98 : vector<1x16xi32>
    %cst_51 = arith.constant 0.000000e+00 : f32
    %100 = vector.broadcast %cst_51 : f32 to vector<1x16xf32>
    %101 = arith.cmpf oeq, %89, %100 : vector<1x16xf32>
    %102 = arith.andi %101, %92 : vector<1x16xi1>
    %103 = arith.extui %102 : vector<1x16xi1> to vector<1x16xi32>
    %104 = arith.ori %84, %103 : vector<1x16xi32>
    %c2_52 = arith.constant 2 : index
    %c0_53 = arith.constant 0 : index
    %c0_54 = arith.constant 0 : index
    %105 = vector.load %arg6[%c2_52, %c0_53, %c0_54] : memref<5x16x16xbf16, #tpu.memory_space<vmem>>, vector<1x16x16xbf16>
    %106 = vector.shape_cast %105 : vector<1x16x16xbf16> to vector<16x16xbf16>
    %cst_55 = arith.constant dense<0.000000e+00> : vector<2x16xf32>
    %107 = tpu.matmul %60, %106, %cst_55 {dimension_numbers = #tpu.dot_dimension_numbers<[1], [0], [0], [1], [0, 0, 1, 1], [], []>} : vector<2x16xbf16>, vector<16x16xbf16>, vector<2x16xf32> -> vector<2x16xf32>
    %cst_56 = arith.constant dense<0.000000e+00> : vector<16xf32>
    %108 = vector.multi_reduction <add>, %107, %cst_56 [0] : vector<2x16xf32> to vector<16xf32>
    %109 = vector.shape_cast %108 : vector<16xf32> to vector<1x16xf32>
    %110 = vector.extract_strided_slice %61 {offsets = [2, 0], sizes = [1, 16], strides = [1, 1]} : vector<6x16xf32> to vector<1x16xf32>
    %cst_57 = arith.constant 0.000000e+00 : f32
    %111 = vector.broadcast %cst_57 : f32 to vector<1x16xf32>
    %112 = arith.cmpf oeq, %110, %111 : vector<1x16xf32>
    %113 = math.absf %109 : vector<1x16xf32>
    %114 = arith.addf %113, %110 : vector<1x16xf32>
    %115 = arith.minimumf %95, %114 : vector<1x16xf32>
    %cst_58 = arith.constant 0.000000e+00 : f32
    %116 = vector.broadcast %cst_58 : f32 to vector<1x16xf32>
    %117 = arith.cmpf olt, %109, %116 : vector<1x16xf32>
    %118 = arith.extui %117 : vector<1x16xi1> to vector<1x16xi32>
    %119 = arith.xori %99, %118 : vector<1x16xi32>
    %cst_59 = arith.constant 0.000000e+00 : f32
    %120 = vector.broadcast %cst_59 : f32 to vector<1x16xf32>
    %121 = arith.cmpf oeq, %109, %120 : vector<1x16xf32>
    %122 = arith.andi %121, %112 : vector<1x16xi1>
    %123 = arith.extui %122 : vector<1x16xi1> to vector<1x16xi32>
    %124 = arith.ori %104, %123 : vector<1x16xi32>
    %c3 = arith.constant 3 : index
    %c0_60 = arith.constant 0 : index
    %c0_61 = arith.constant 0 : index
    %125 = vector.load %arg6[%c3, %c0_60, %c0_61] : memref<5x16x16xbf16, #tpu.memory_space<vmem>>, vector<1x16x16xbf16>
    %126 = vector.shape_cast %125 : vector<1x16x16xbf16> to vector<16x16xbf16>
    %cst_62 = arith.constant dense<0.000000e+00> : vector<2x16xf32>
    %127 = tpu.matmul %60, %126, %cst_62 {dimension_numbers = #tpu.dot_dimension_numbers<[1], [0], [0], [1], [0, 0, 1, 1], [], []>} : vector<2x16xbf16>, vector<16x16xbf16>, vector<2x16xf32> -> vector<2x16xf32>
    %cst_63 = arith.constant dense<0.000000e+00> : vector<16xf32>
    %128 = vector.multi_reduction <add>, %127, %cst_63 [0] : vector<2x16xf32> to vector<16xf32>
    %129 = vector.shape_cast %128 : vector<16xf32> to vector<1x16xf32>
    %130 = vector.extract_strided_slice %61 {offsets = [3, 0], sizes = [1, 16], strides = [1, 1]} : vector<6x16xf32> to vector<1x16xf32>
    %cst_64 = arith.constant 0.000000e+00 : f32
    %131 = vector.broadcast %cst_64 : f32 to vector<1x16xf32>
    %132 = arith.cmpf oeq, %130, %131 : vector<1x16xf32>
    %133 = math.absf %129 : vector<1x16xf32>
    %134 = arith.addf %133, %130 : vector<1x16xf32>
    %135 = arith.minimumf %115, %134 : vector<1x16xf32>
    %cst_65 = arith.constant 0.000000e+00 : f32
    %136 = vector.broadcast %cst_65 : f32 to vector<1x16xf32>
    %137 = arith.cmpf olt, %129, %136 : vector<1x16xf32>
    %138 = arith.extui %137 : vector<1x16xi1> to vector<1x16xi32>
    %139 = arith.xori %119, %138 : vector<1x16xi32>
    %cst_66 = arith.constant 0.000000e+00 : f32
    %140 = vector.broadcast %cst_66 : f32 to vector<1x16xf32>
    %141 = arith.cmpf oeq, %129, %140 : vector<1x16xf32>
    %142 = arith.andi %141, %132 : vector<1x16xi1>
    %143 = arith.extui %142 : vector<1x16xi1> to vector<1x16xi32>
    %144 = arith.ori %124, %143 : vector<1x16xi32>
    %c4 = arith.constant 4 : index
    %c0_67 = arith.constant 0 : index
    %c0_68 = arith.constant 0 : index
    %145 = vector.load %arg6[%c4, %c0_67, %c0_68] : memref<5x16x16xbf16, #tpu.memory_space<vmem>>, vector<1x16x16xbf16>
    %146 = vector.shape_cast %145 : vector<1x16x16xbf16> to vector<16x16xbf16>
    %cst_69 = arith.constant dense<0.000000e+00> : vector<2x16xf32>
    %147 = tpu.matmul %60, %146, %cst_69 {dimension_numbers = #tpu.dot_dimension_numbers<[1], [0], [0], [1], [0, 0, 1, 1], [], []>} : vector<2x16xbf16>, vector<16x16xbf16>, vector<2x16xf32> -> vector<2x16xf32>
    %cst_70 = arith.constant dense<0.000000e+00> : vector<16xf32>
    %148 = vector.multi_reduction <add>, %147, %cst_70 [0] : vector<2x16xf32> to vector<16xf32>
    %149 = vector.shape_cast %148 : vector<16xf32> to vector<1x16xf32>
    %150 = vector.extract_strided_slice %61 {offsets = [4, 0], sizes = [1, 16], strides = [1, 1]} : vector<6x16xf32> to vector<1x16xf32>
    %cst_71 = arith.constant 0.000000e+00 : f32
    %151 = vector.broadcast %cst_71 : f32 to vector<1x16xf32>
    %152 = arith.cmpf oeq, %150, %151 : vector<1x16xf32>
    %153 = math.absf %149 : vector<1x16xf32>
    %154 = arith.addf %153, %150 : vector<1x16xf32>
    %155 = arith.minimumf %135, %154 : vector<1x16xf32>
    %cst_72 = arith.constant 0.000000e+00 : f32
    %156 = vector.broadcast %cst_72 : f32 to vector<1x16xf32>
    %157 = arith.cmpf olt, %149, %156 : vector<1x16xf32>
    %158 = arith.extui %157 : vector<1x16xi1> to vector<1x16xi32>
    %159 = arith.xori %139, %158 : vector<1x16xi32>
    %cst_73 = arith.constant 0.000000e+00 : f32
    %160 = vector.broadcast %cst_73 : f32 to vector<1x16xf32>
    %161 = arith.cmpf oeq, %149, %160 : vector<1x16xf32>
    %162 = arith.andi %161, %152 : vector<1x16xi1>
    %163 = arith.extui %162 : vector<1x16xi1> to vector<1x16xi32>
    %164 = arith.ori %144, %163 : vector<1x16xi32>
    %c0_i32_74 = arith.constant 0 : i32
    %165 = vector.broadcast %c0_i32_74 : i32 to vector<1x16xi32>
    %166 = arith.cmpi sgt, %164, %165 : vector<1x16xi32>
    %167 = arith.sitofp %159 : vector<1x16xi32> to vector<1x16xf32>
    %cst_75 = arith.constant 2.000000e+00 : f32
    %168 = vector.broadcast %cst_75 : f32 to vector<1x16xf32>
    %169 = arith.mulf %168, %167 : vector<1x16xf32>
    %cst_76 = arith.constant 1.000000e+00 : f32
    %170 = vector.broadcast %cst_76 : f32 to vector<1x16xf32>
    %171 = arith.subf %170, %169 : vector<1x16xf32>
    %cst_77 = arith.constant 0.000000e+00 : f32
    %172 = vector.broadcast %cst_77 : f32 to vector<1x16xf32>
    %173 = arith.select %166, %172, %171 : vector<1x16xi1>, vector<1x16xf32>
    %174 = arith.mulf %173, %155 : vector<1x16xf32>
    %175 = vector.extract_strided_slice %61 {offsets = [5, 0], sizes = [1, 16], strides = [1, 1]} : vector<6x16xf32> to vector<1x16xf32>
    %176 = arith.mulf %174, %175 : vector<1x16xf32>
    %c0_78 = arith.constant 0 : index
    %c0_79 = arith.constant 0 : index
    %c0_80 = arith.constant 0 : index
    %177 = vector.load %arg10[%c0_78, %c0_79, %c0_80] : memref<1x1x16xf32, #tpu.memory_space<vmem>>, vector<1x1x16xf32>
    %178 = vector.shape_cast %177 : vector<1x1x16xf32> to vector<1x16xf32>
    %179 = vector.shape_cast %176 : vector<1x16xf32> to vector<1x1x16xf32>
    tpu.vector_store %arg10[%c0_78, %c0_79, %c0_80], %179 {strides = array<i32>} : memref<1x1x16xf32, #tpu.memory_space<vmem>>, vector<1x1x16xf32>,
    return
  }
  func.func @transform_0(%arg0: i32) -> (i32, i32, i32) {
    %c0_i32 = arith.constant 0 : i32
    %c0_i32_0 = arith.constant 0 : i32
    %c0_i32_1 = arith.constant 0 : i32
    return %arg0, %c0_i32, %c0_i32_0 : i32, i32, i32
  }
  func.func @transform_1(%arg0: i32) -> (i32, i32) {
    %c0_i32 = arith.constant 0 : i32
    %c0_i32_0 = arith.constant 0 : i32
    %c0_i32_1 = arith.constant 0 : i32
    return %c0_i32, %c0_i32_0 : i32, i32
  }
  func.func @transform_2(%arg0: i32) -> (i32, i32, i32) {
    %c0_i32 = arith.constant 0 : i32
    %c0_i32_0 = arith.constant 0 : i32
    %c0_i32_1 = arith.constant 0 : i32
    %c0_i32_2 = arith.constant 0 : i32
    return %c0_i32, %c0_i32_0, %c0_i32_1 : i32, i32, i32
  }
  func.func @transform_3(%arg0: i32) -> (i32, i32, i32) {
    %c0_i32 = arith.constant 0 : i32
    %c0_i32_0 = arith.constant 0 : i32
    %c0_i32_1 = arith.constant 0 : i32
    %c0_i32_2 = arith.constant 0 : i32
    return %c0_i32, %c0_i32_0, %c0_i32_1 : i32, i32, i32
  }
  func.func @transform_4(%arg0: i32) -> (i32, i32) {
    %c0_i32 = arith.constant 0 : i32
    %c0_i32_0 = arith.constant 0 : i32
    %c0_i32_1 = arith.constant 0 : i32
    return %c0_i32, %c0_i32_0 : i32, i32
  }
  func.func @transform_5(%arg0: i32) -> (i32, i32, i32) {
    %c0_i32 = arith.constant 0 : i32
    %c0_i32_0 = arith.constant 0 : i32
    %c0_i32_1 = arith.constant 0 : i32
    %c0_i32_2 = arith.constant 0 : i32
    return %c0_i32, %c0_i32_0, %c0_i32_1 : i32, i32, i32
  }
  func.func @transform_6(%arg0: i32) -> (i32, i32) {
    %c0_i32 = arith.constant 0 : i32
    %c0_i32_0 = arith.constant 0 : i32
    %c0_i32_1 = arith.constant 0 : i32
    return %c0_i32, %c0_i32_0 : i32, i32
  }
  func.func @transform_7(%arg0: i32) -> (i32, i32, i32) {
    %c0_i32 = arith.constant 0 : i32
    %c0_i32_0 = arith.constant 0 : i32
    %c0_i32_1 = arith.constant 0 : i32
    return %arg0, %c0_i32, %c0_i32_0 : i32, i32, i32
  }
  func.func @transform_8(%arg0: i32) -> (i32, i32, i32) {
    %c0_i32 = arith.constant 0 : i32
    %c0_i32_0 = arith.constant 0 : i32
    %c0_i32_1 = arith.constant 0 : i32
    return %arg0, %c0_i32, %c0_i32_0 : i32, i32, i32
  }
  func.func @transform_9(%arg0: i32) -> (i32, i32, i32) {
    %c0_i32 = arith.constant 0 : i32
    %c0_i32_0 = arith.constant 0 : i32
    %c0_i32_1 = arith.constant 0 : i32
    return %arg0, %c0_i32, %c0_i32_0 : i32, i32, i32
  }
}

</mosaic_0001>

<bundles_post_ra>
// kernel: custom_check_message_gnn_forward.1
= control target key start
LH: loop header
LB: loop body
LE: loop exit
PB: predicated region body
PF: predicated region fallthrough
CT: control target
= control target key end

     0   :  { %s2116_s0 = inlined_call_operand.vmem [shape: bf16[2,16,32], index: 0, kind: input, shape index: {}]   ;;  %s2117_s1 = inlined_call_operand.vmem [shape: bf16[16,32], index: 1, kind: input, shape index: {}]   ;;  %s2118_s2 = inlined_call_operand.vmem [shape: bf16[2,16,16], index: 2, kind: input, shape index: {}]   ;;  %s2119_s3 = inlined_call_operand.vmem [shape: bf16[3,64,32], index: 3, kind: input, shape index: {}]   ;;  %s2120_s4 = inlined_call_operand.vmem [shape: f32[8,32], index: 4, kind: input, shape index: {}]   ;;  %s2121_s5 = inlined_call_operand.vmem [shape: bf16[5,16,16], index: 5, kind: input, shape index: {}]   ;;  %s2122_s6 = inlined_call_operand.vmem [shape: f32[6,16], index: 6, kind: input, shape index: {}]   ;;  %s2123_s7 = inlined_call_operand.hbm [shape: f32[2,16,32], index: 7, kind: output, shape index: {0}]   ;;  %s2124_s8 = inlined_call_operand.hbm [shape: f32[2,1,16], index: 8, kind: output, shape index: {1}]   ;;  %s2125_s9 = inlined_call_operand.hbm [shape: f32[2,1,16], index: 9, kind: output, shape index: {2}]  }
   0x1   :  { %2128 = sst [smem:[#allocation9_spill]] %s2116_s0 }
   0x2   :  { %2129 = sst [smem:[#allocation10_spill]] %s2117_s1 }
   0x3   :  { %15 = vsyncpa [#allocation3], 0 }
   0x4   :  { %17 = vsyncpa [#allocation3 + $0x1], 0 }
   0x5   :  { %18 = vsyncpa [#allocation5], 0 }
   0x6   :  { %20 = vsyncpa [#allocation5 + $0x1], 0  ;;  %s1776_s30 = smov 0   ;;  %s1778_s10 = smov 0  }
   0x7   :  { %s1780_s11 = smov 0   ;;  %s1782_s12 = smov 0  }
   0x8 LB: > { %s1797_s13 = sadd.s32 4294967295, %s1715_s12   ;;  %s2126_s14 = sadd.s32 4294967294, %s1715_s12   ;;  %s1715_s12 = sphi %s1782_s12, %s2143_s12   ;;  %s1711_s11 = sphi %s1780_s11, %s2142_s11   ;;  %s1707_s10 = sphi %s1778_s10, %s2141_s10   ;;  %s1703_s30 = sphi %s1776_s30, %s2140_s30  }
   0x9   : > { %s1801_s15 = sadd.s32 1, %s1715_s12   ;;  %s185_s16 = sadd.s32 1, %s1711_s11 }
   0xa   : > { %s182_s17 = ssub.s32 %s1715_s12, %s1801_s15  ;;  %p195_p0 = scmp.ne.s32.totalorder %s1711_s11, %s1707_s10 }
   0xb   : > { %p183_p1 = scmp.eq.s32.totalorder %s182_s17, 0  ;;  %p196_p2 = scmp.eq.s32.totalorder %s1797_s13, 1 }
   0xc   : > { %p201_p3 = scmp.ne.s32.totalorder %s1707_s10, %s1703_s30  ;;  %p202_p4 = scmp.eq.s32.totalorder %s2126_s14, 1 }
   0xd   : > { %s1814_s18 = scalar_select %p183_p1, %s1711_s11, %s185_s16  }
   0xe   : > { %p1816_p5 = por %p196_p2, %p195_p0  ;;  %p1820_p6 = por %p202_p4, %p201_p3 }
   0xf   : > { %p1330_p7 = scmp.ge.s32.totalorder %s1715_s12, 1  ;;  %p298_p8 = scmp.lt.s32.totalorder %s1715_s12, 3 }
  0x11   : > { %p299_p9 = pnand %p1330_p7, %p298_p8 }
  0x12   : > { %p342_p10 = scmp.lt.s32.totalorder (!%p299_p9), %s1797_s13, 1  ;;  %s2132_s1 = sld [smem:[#allocation10_spill]] (!%p299_p9) }
  0x13   : > { %302 = sbr.rel (%p299_p9) target bundleno = 1337 (0x539), region = 48  ;;  %s2133_s0 = sld [smem:[#allocation9_spill]] (!%p299_p9) }
  0x14   : > { %s1719_s26 = smov (!%p299_p9), 32   ;;  %s2127_s23 = sshll.u32 (!%p299_p9), %s1797_s13, 4 }
  0x18   : > { %v1717_v0 = vmov 0.0   ;;  %vm1718_vm0 = vmmov 0   ;;  %s343_s21 = scalar_select %p342_p10, %s1797_s13, 1  ;;  %v1405_v1 = vld [vmem:[%s2132_s1] sm:$0xff]   ;;  %vm367_vm1 = vcmask 130048   ;;  %v1580_v9 = vld [vmem:[%s2118_s2 + $0x8] sm:$0xff]   ;;  %v486_v38 = vlaneseq }
  0x19   : > { %1445 = vmatprep.subr.bf16.mxu1 %v1717_v0  ;;  %1447 = vmatprep.mubr.msk.bf16.mxu1 %vm1718_vm0, %v1717_v0  ;;  %v1406_v2 = vunpack.c.l.bf16 %v1405_v1  ;;  %v1407_v3 = vunpack.c.h.bf16 %v1405_v1  ;;  %v1581_v10 = vld [vmem:[%s2118_s2] sm:$0xff]   ;;  %v1582_v12 = vld [vmem:[%s2119_s3 + $0x38] sm:$0xff]   ;;  %v1583_v13 = vld [vmem:[%s2119_s3 + $0x30] sm:$0xff]   ;;  %vm468_vm2 = vcmask 261120   ;;  %vm514_vm3 = vcmask 523264  }
  0x1a   : > { %1439 = vmatprep.subr.bf16.mxu0 %v1717_v0  ;;  %1441 = vmatprep.mubr.msk.bf16.mxu0 %vm1718_vm0, %v1717_v0  ;;  %s1398_s24 = sshll.u32 %s343_s21, 3  ;;  %v1584_v14 = vld [vmem:[%s2119_s3 + $0x28] sm:$0xff]   ;;  %v1585_v15 = vld [vmem:[%s2119_s3 + $0x20] sm:$0xff]   ;;  %v1586_v16 = vld [vmem:[%s2119_s3 + $0x18] sm:$0xff]   ;;  %v487_v39 = vshrl.u32 %v486_v38, 7  ;;  %vm790_vm4 = vcmask 122880  }
  0x1b   : > { %s346_s27 = scalar_lea.vmem %s2133_s0, %s1398_s24  ;;  %v1587_v17 = vld [vmem:[%s2119_s3 + $0x10] sm:$0xff]   ;;  %v1588_v20 = vld [vmem:[%s2119_s3 + $0x8] sm:$0xff]   ;;  %v1589_v26 = vld [vmem:[%s2119_s3] sm:$0xff]   ;;  %vm800_vm5 = vcmask 1040384   ;;  %vm801_vm6 = vsmask.f32 256 }
  0x1c   : > { %v1401_v4 = vld [vmem:[%s346_s27] sm:$0xff]   ;;  %v1590_v34 = vld [vmem:[%s2119_s3 + $0x58] sm:$0xff]   ;;  %v1591_v35 = vld [vmem:[%s2119_s3 + $0x50] sm:$0xff]   ;;  %v571_v40 = vsub.s32 1, %v487_v39  ;;  %v488_v42 = vsub.s32 0, %v487_v39  ;;  %s1923_s27 = sand.u32 1, %s1707_s10  }
  0x1d   : > { %v1402_v5 = vunpack.c.l.bf16 %v1401_v4  ;;  %v1403_v6 = vunpack.c.h.bf16 %v1401_v4  ;;  %v1592_v36 = vld [vmem:[%s2119_s3 + $0x48] sm:$0xff]   ;;  %v1593_v37 = vld [vmem:[%s2119_s3 + $0x40] sm:$0xff]   ;;  %s335_s22 = scalar_lea.vmem [#allocation4], %s1923_s27  ;;  %vm802_vm7 = vmand %vm800_vm5, %vm801_vm6  ;;  %s1169_s21 = sand.u32 1, %s1797_s13  }
  0x1e   : > { %v348_v41 = vld [vmem:[%s2120_s4] sm:$0xff]  ;;  %s1202_s29 = sshll.u32 %s335_s22, 4  ;;  %s1984_s16 = scalar_lea.sflag [#allocation5], %s1169_s21  ;;  %s1203_s29 = int_to_ptr.vmem [resolvable:$true] %s1202_s29 }
  0x1f   : > { %v357_v7 = vadd.f32 %v1406_v2, %v1402_v5  ;;  %v358_v8 = vadd.f32 %v1407_v3, %v1403_v6  ;;  %v572_v43 = vrot.slane %v348_v41, %v571_v40  ;;  %v489_v45 = vrot.slane %v348_v41, %v488_v42  ;;  %s1599_s14 = scalar_lea.vmem %s1203_s29, 16 }
  0x20   : > { %v1720_v2 = vmov 0   ;;  %v661_v3 = vsub.s32 2, %v487_v39  ;;  %p1600_p11 = scmp.ne.s32.totalorder %s1203_s29, %s1599_s14 }
  0x21   : > { %v359_v11 = vpack.c.bf16 %v358_v8, %v357_v7  ;;  %1578 = vset.pattern.permute.xlu1 %v1720_v2  ;;  %1579 = vset.pattern.permute.xlu0 %v1720_v2 }
  0x22   : > { %v662_v4 = vrot.slane %v348_v41, %v661_v3  ;;  %p1601_p12 = pnand %p1600_p11, %p1816_p5 }
  0x23   : > { %1446 = vmatpush3.bf16.msra.mxu1 %v359_v11  ;;  %1440 = vmatpush3.bf16.msra.mxu0 %v359_v11 }
  0x24   : > { %1463 = vmatprep.subr.bf16.mxu1 %v1717_v0  ;;  %1451 = vmatprep.subr.bf16.mxu0 %v1717_v0  ;;  %p1602_p13 = pneg %p1601_p12 }
  0x26   : > { %1448 = vmatmul.mubr.msk.bf16.vlgmr.msra.gmra.mxu1 %vm367_vm1, %v1580_v9  ;;  %1442 = vmatmul.mubr.msk.bf16.vlgmr.msra.gmra.mxu0 %vm367_vm1, %v1581_v10  ;;  %v732_v10 = vpack.c.bf16 %v348_v41, %v348_v41 }
  0x27   : > { %1471 = vmatprep.mubr.msk.bf16.mxu1 %vm1718_vm0, %v1717_v0  ;;  %1459 = vmatprep.mubr.msk.bf16.mxu0 %vm1718_vm0, %v1717_v0 }
  0x28   : > { %1464 = vmatpush3.bf16.msra.mxu1 %v1582_v12  ;;  %1452 = vmatpush3.bf16.msra.mxu0 %v1586_v16  ;;  %v1594_v16 = vld [vmem:[%s2121_s5] sm:$0xff]  }
  0x29   : > { %1465 = vmatprep.subr.bf16.mxu1 %v1717_v0  ;;  %1453 = vmatprep.subr.bf16.mxu0 %v1717_v0 }
  0x2c   : > { %1466 = vmatpush3.bf16.msra.mxu1 %v1583_v13  ;;  %1454 = vmatpush3.bf16.msra.mxu0 %v1587_v17  ;;  %v1595_v17 = vld [vmem:[%s2121_s5 + $0x8] sm:$0xff]  }
  0x2d   : > { %1467 = vmatprep.subr.bf16.mxu1 %v1717_v0  ;;  %1455 = vmatprep.subr.bf16.mxu0 %v1717_v0 }
  0x30   : > { %1468 = vmatpush3.bf16.msra.mxu1 %v1584_v14  ;;  %1456 = vmatpush3.bf16.msra.mxu0 %v1588_v20  ;;  %v739_v14 = vshrl.u32 %v732_v10, 16 }
  0x31   : > { %1469 = vmatprep.subr.bf16.mxu1 %v1717_v0  ;;  %1457 = vmatprep.subr.bf16.mxu0 %v1717_v0 }
  0x34   : > { %1470 = vmatpush3.bf16.msra.mxu1 %v1585_v15  ;;  %1458 = vmatpush3.bf16.msra.mxu0 %v1589_v26  ;;  %v741_v15 = vrot.slane %v739_v14, 1 }
  0x35   : > { %1487 = vmatprep.subr.bf16.mxu1 %v1717_v0  ;;  %1475 = vmatprep.subr.bf16.mxu0 %v1717_v0 }
  0xe6   : > { %v457_v18 = vpop.f32.mrf.mxu1  ;;  %v405_v19 = vpop.f32.mrf.mxu0 }
  0xe8   : > { %v1449_v21 = vpop.f32.mrf.mxu1  ;;  %v1443_v22 = vpop.f32.mrf.mxu0 }
  0xea   : > { %v460_v23 = vpop.f32.mrf.mxu1  ;;  %v408_v24 = vpop.f32.mrf.mxu0 }
  0xeb   : > { %v472_v25 = vpack.c.bf16 %v460_v23, %v457_v18  ;;  %v464_v29 = vpack.c.bf16 %v408_v24, %v405_v19 }
  0xec   : > { %v1450_v27 = vpop.f32.mrf.mxu1  ;;  %v1444_v28 = vpop.f32.mrf.mxu0 }
  0xed   : > { %474 = vrot.lane.b32.xlu0 %v472_v25, %s1719_s26 }
  0xf1   : > { %466 = vrot.lane.b32.xlu0 %v464_v29, %s1719_s26 }
 0x15f   : > { %v475_v30 = vpop.permute.xlu0 %474 }
 0x160   : > { %v477_v31 = vsel %vm468_vm2, %v359_v11, %v475_v30  ;;  %v1596_v30 = vld [vmem:[%s2121_s5 + $0x10] sm:$0xff]  }
 0x161   : > { %1472 = vmatmul.mubr.msk.bf16.vlgmr.msra.gmra.mxu1 %vm514_vm3, %v477_v31  ;;  %v1597_v31 = vld [vmem:[%s2121_s5 + $0x18] sm:$0xff]  }
 0x162   : > { %1489 = vmatprep.mubr.msk.bf16.mxu1 %vm1718_vm0, %v1717_v0 }
 0x163   : > { %v467_v32 = vpop.permute.xlu0 %466 }
 0x164   : > { %v471_v33 = vsel %vm468_vm2, %v359_v11, %v467_v32 }
 0x165   : > { %1460 = vmatmul.mubr.msk.bf16.vlgmr.msra.gmra.mxu0 %vm514_vm3, %v471_v33  ;;  %v1598_v33 = vld [vmem:[%s2121_s5 + $0x20] sm:$0xff]  }
 0x166   : > { %1483 = vmatprep.mubr.msk.bf16.mxu0 %vm1718_vm0, %v1717_v0  ;;  %1476 = vmatpush3.bf16.msra.mxu0 %v1590_v34 }
 0x167   : > { %1477 = vmatprep.subr.bf16.mxu0 %v1717_v0 }
 0x16a   : > { %1478 = vmatpush3.bf16.msra.mxu0 %v1591_v35 }
 0x16b   : > { %1479 = vmatprep.subr.bf16.mxu0 %v1717_v0 }
 0x16e   : > { %1480 = vmatpush3.bf16.msra.mxu0 %v1592_v36 }
 0x16f   : > { %1481 = vmatprep.subr.bf16.mxu0 %v1717_v0 }
 0x172   : > { %1482 = vmatpush3.bf16.msra.mxu0 %v1593_v37 }
 0x173   : > { %1499 = vmatprep.subr.bf16.mxu0 %v1717_v0 }
 0x221   : > { %v633_v44 = vpop.f32.mrf.mxu1 }
 0x222   : > { %v634_v47 = vadd.f32 %v633_v44, %v572_v43 }
 0x223   : > { %v1473_v46 = vpop.f32.mrf.mxu1 }
 0x224   : > { %v640_v54 = vmax.f32 %v634_v47, 0.0 }
 0x225   : > { %v636_v48 = vpop.f32.mrf.mxu1  ;;  %v551_v49 = vpop.f32.mrf.mxu0 }
 0x226   : > { %v637_v50 = vadd.f32 %v636_v48, %v572_v43  ;;  %v552_v51 = vadd.f32 %v551_v49, %v489_v45 }
 0x227   : > { %v1474_v52 = vpop.f32.mrf.mxu1  ;;  %v1461_v53 = vpop.f32.mrf.mxu0 }
 0x228   : > { %v641_v55 = vmax.f32 %v637_v50, 0.0  ;;  %v558_v58 = vmax.f32 %v552_v51, 0.0 }
 0x229   : > { %v554_v56 = vpop.f32.mrf.mxu0 }
 0x22a   : > { %v643_v57 = vpack.c.bf16 %v641_v55, %v640_v54  ;;  %v555_v59 = vadd.f32 %v554_v56, %v489_v45 }
 0x22b   : > { %v1462_v60 = vpop.f32.mrf.mxu0 }
 0x22c   : > { %645 = vrot.lane.b32.xlu1 %v643_v57, %s1719_s26  ;;  %v559_v61 = vmax.f32 %v555_v59, 0.0  ;;  %s1331_s26 = sshll.u32 %s1923_s27, 4 }
 0x22d   : > { %s1926_s28 = scalar_lea.vmem [#allocation2], %s1331_s26  ;;  %s1978_s26 = scalar_lea.hbm %s2124_s8, %s2127_s23 }
 0x22e   : > { %v642_v62 = vpack.c.bf16 %v559_v61, %v558_v58  ;;  %s1186_s17 = sshll.u32 %s1926_s28, 4  ;;  %s1980_s17 = int_to_ptr.vmem [resolvable:$true] %s1186_s17 }
 0x230   : > { %736 = vperm.xlu1 %1578, %v348_v41  }
 0x29e   : > { %v646_v63 = vpop.permute.xlu1 %645 }
 0x29f   : > { %v649_v1 = vsel %vm468_vm2, %v642_v62, %v646_v63 }
 0x2a0   : > { %1484 = vmatmul.mubr.msk.bf16.vlgmr.msra.gmra.mxu0 %vm514_vm3, %v649_v1 }
 0x2a1   : > { %1501 = vmatprep.mubr.msk.bf16.mxu0 %vm1718_vm0, %v1717_v0  ;;  %1500 = vmatpush3.bf16.msra.mxu0 %v1595_v17 }
 0x2a2   : > { %1511 = vmatprep.subr.bf16.mxu0 %v1717_v0 }
 0x2ab   : > { %v737_v18 = vpop.permute.xlu1 %736 }
 0x2ac   : > { %v742_v19 = vrot.slane %v737_v18, 4 }
 0x360   : > { %v723_v5 = vpop.f32.mrf.mxu0 }
 0x361   : > { %v724_v6 = vadd.f32 %v723_v5, %v662_v4 }
 0x362   : > { %v1485_v7 = vpop.f32.mrf.mxu0 }
 0x363   : > { %730 = vst.msk [vmem:[%s1926_s28] sm:$0xff] %vm468_vm2, %v724_v6 }
 0x364   : > { %v726_v8 = vpop.f32.mrf.mxu0 }
 0x365   : > { %v727_v9 = vadd.f32 %v726_v8, %v662_v4 }
 0x366   : > { %v1486_v11 = vpop.f32.mrf.mxu0 }
 0x367   : > { %731 = vst.msk [vmem:[%s1926_s28 + $0x8] sm:$0xff] %vm468_vm2, %v727_v9  ;;  %v733_v12 = vpack.c.bf16 %v727_v9, %v724_v6  ;;  %s1721_s28 = smov [#allocation4]  }
 0x368   : > { %s1603_s0 = sshll.u32 %s1721_s28, 4  ;;  %s1604_s0 = int_to_ptr.vmem [resolvable:$false] %s1603_s0 }
 0x369   : > { %v748_v13 = vsel %vm468_vm2, %v733_v12, 0  ;;  %s1605_s1 = scalar_lea.vmem %s1604_s0, 32  ;;  %p1606_p0 = scmp.lt.s32.totalorder %s1203_s29, %s1604_s0 }
 0x36a   : > { %1488 = vmatpush3.bf16.xpose.msra.mxu1 %v748_v13  ;;  %p1607_p1 = scmp.lt.s32.totalorder %s1605_s1, %s1599_s14 }
 0x36b   : > { %1493 = vmatprep.subr.bf16.mxu1 %v1717_v0 }
 0x36c   : > { %p1608_p2 = por %p1607_p1, %p1606_p0 }
 0x36e   : > { %p1609_p3 = pnand %p1608_p2, %p1602_p13 }
 0x371   : > { %1490 = vmatmul.mubr.msk.bf16.vlgmr.msra.gmra.mxu1 %vm468_vm2, %v741_v15 }
 0x372   : > { %1495 = vmatprep.mubr.msk.bf16.mxu1 %vm1718_vm0, %v1717_v0  ;;  %1494 = vmatpush3.bf16.msra.mxu1 %v1594_v16 }
 0x373   : > { %1505 = vmatprep.subr.bf16.mxu1 %v1717_v0 }
 0x431   : > { %v784_v20 = vpop.f32.mrf.mxu1 }
 0x432   : > { %v785_v21 = vadd.f32 %v784_v20, %v742_v19 }
 0x433   : > { %v1491_v22 = vpop.f32.mrf.mxu1 }
 0x434   : > { %v792_v23 = vpack.c.bf16 %v785_v21, %v785_v21  ;;  %791 = vst.msk [vmem:[%s335_s22] sm:$0x1] %vm790_vm4, %v785_v21 }
 0x435   : > { %v787_v24 = vpop.f32.mrf.mxu1 }
 0x436   : > { %v793_v25 = vunpack.c.l.bf16 %v792_v23 }
 0x437   : > { %v1492_v26 = vpop.f32.mrf.mxu1 }
 0x438   : > { %v794_v27 = vsub.f32 %v785_v21, %v793_v25 }
 0x43a   : > { %v795_v28 = vpack.c.bf16 %v794_v27, %v794_v27 }
 0x43c   : > { %v797_v29 = vshll.u32 %v795_v28, 16 }
 0x43e   : > { %v803_v32 = vsel %vm802_vm7, %v792_v23, %v797_v29 }
 0x43f   : > { %1496 = vmatmul.mubr.msk.bf16.vlgmr.msra.gmra.mxu1 %vm367_vm1, %v803_v32  ;;  %1502 = vmatmul.mubr.msk.bf16.vlgmr.msra.gmra.mxu0 %vm367_vm1, %v803_v32 }
 0x440   : > { %1506 = vmatpush3.bf16.msra.mxu1 %v1596_v30  ;;  %1512 = vmatpush3.bf16.msra.mxu0 %v1597_v31 }
 0x441   : > { %1507 = vmatprep.mubr.msk.bf16.mxu1 %vm1718_vm0, %v1717_v0  ;;  %1513 = vmatprep.mubr.msk.bf16.mxu0 %vm1718_vm0, %v1717_v0 }
 0x442   : > { %1517 = vmatprep.subr.bf16.mxu1 %v1717_v0 }
 0x447   : > { %1508 = vmatmul.mubr.msk.bf16.vlgmr.msra.gmra.mxu1 %vm367_vm1, %v803_v32  ;;  %1514 = vmatmul.mubr.msk.bf16.vlgmr.msra.gmra.mxu0 %vm367_vm1, %v803_v32 }
 0x448   : > { %1518 = vmatpush3.bf16.msra.mxu1 %v1598_v33  ;;  %1519 = vmatprep.mubr.msk.bf16.mxu1 %vm1718_vm0, %v1717_v0 }
 0x44f   : > { %1520 = vmatmul.mubr.msk.bf16.vlgmr.msra.gmra.mxu1 %vm367_vm1, %v803_v32 }
 0x450   : > { %1612 = shalt.err (!%p1609_p3)
}
 0x451   : > { %s1613_s22 = scalar_lea.hbm %s1978_s26, 16  ;;  %s1617_s25 = scalar_lea.hbm %s2124_s8, 32 }
 0x452   : > { %p1614_p4 = scmp.ne.s32.totalorder %s1978_s26, %s1613_s22  ;;  %p1618_p9 = scmp.lt.s32.totalorder %s1978_s26, %s2124_s8 }
 0x453   : > { %p1619_p10 = scmp.lt.s32.totalorder %s1617_s25, %s1613_s22 }
 0x454   : > { %p1615_p7 = pnand %p1614_p4, %p1816_p5 }
 0x455   : > { %p1620_p11 = por %p1619_p10, %p1618_p9 }
 0x456   : > { %p1616_p8 = pneg %p1615_p7 }
 0x458   : > { %p1621_p12 = pnand %p1620_p11, %p1616_p8 }
 0x45a   : > { %1624 = shalt.err (!%p1621_p12)
}
 0x45b   : > { %1524 = dma.vmem_to_hbm [thread:$0]  (%p1816_p5), %s1203_s29, 16, %s1978_s26, %s1984_s16  }
 0x45c   : > { %s1399_s0 = sshll.u32 %s1797_s13, 8  ;;  %s1165_s22 = scalar_lea.sflag [#allocation3], %s1923_s27 }
 0x45d   : > { %s2007_s23 = scalar_lea.hbm %s2123_s7, %s1399_s0  ;;  %s1625_s21 = scalar_lea.vmem %s1980_s17, 256 }
 0x45e   : > { %p1626_p13 = scmp.ne.s32.totalorder %s1980_s17, %s1625_s21  ;;  %s1722_s24 = smov [#allocation2]  }
 0x45f   : > { %s1629_s25 = sshll.u32 %s1722_s24, 4  ;;  %s1630_s25 = int_to_ptr.vmem [resolvable:$false] %s1629_s25 }
 0x460   : > { %p1627_p0 = pnand %p1626_p13, %p1816_p5  ;;  %s1631_s28 = scalar_lea.vmem %s1630_s25, 512 }
 0x461   : > { %p1632_p2 = scmp.lt.s32.totalorder %s1980_s17, %s1630_s25  ;;  %p1633_p3 = scmp.lt.s32.totalorder %s1631_s28, %s1625_s21 }
 0x462   : > { %p1628_p1 = pneg %p1627_p0 }
 0x463   : > { %p1634_p4 = por %p1633_p3, %p1632_p2 }
 0x465   : > { %p1635_p7 = pnand %p1634_p4, %p1628_p1 }
 0x467   : > { %1638 = shalt.err (!%p1635_p7)
}
 0x468   : > { %s1639_s26 = scalar_lea.hbm %s2007_s23, 256  ;;  %s1643_s1 = scalar_lea.hbm %s2123_s7, 512 }
 0x469   : > { %p1640_p8 = scmp.ne.s32.totalorder %s2007_s23, %s1639_s26  ;;  %p1644_p11 = scmp.lt.s32.totalorder %s2007_s23, %s2123_s7 }
 0x46a   : > { %p1645_p12 = scmp.lt.s32.totalorder %s1643_s1, %s1639_s26 }
 0x46b   : > { %p1641_p9 = pnand %p1640_p8, %p1816_p5 }
 0x46c   : > { %p1646_p13 = por %p1645_p12, %p1644_p11 }
 0x46d   : > { %p1642_p10 = pneg %p1641_p9 }
 0x46f   : > { %p1647_p0 = pnand %p1646_p13, %p1642_p10 }
 0x471   : > { %1650 = shalt.err (!%p1647_p0)
}
 0x472   : > { %s1723_s21 = smov 128   ;;  %s1724_s25 = smov 8   ;;  %vm856_vm8 = vcmask 123904   ;;  %v2039_v5 = vld [vmem:[%s2122_s6] sm:$0x3f] }
 0x473   : > { %1523 = dma.vmem_to_hbm [thread:$0]  (%p1816_p5), %s1980_s17, 256, %s2007_s23, %s1165_s22, %s1723_s21, %s1723_s21, %s1724_s25   ;;  %vm864_vm9 = vcmp.eq.f32.partialorder %v2039_v5, 0.0 }
 0x474   : > { %s341_s22 = scalar_lea.vmem [#allocation6], %s1923_s27  ;;  %s2138_s26 = sshll.u32 %s1797_s13, 4 }
 0x475   : > { %s1215_s28 = sshll.u32 %s341_s22, 4  ;;  %s1213_s1 = scalar_lea.hbm %s2125_s9, %s2138_s26  ;;  %s1216_s28 = int_to_ptr.vmem [resolvable:$true] %s1215_s28 }
 0x476   : > { %s1651_s14 = scalar_lea.vmem %s1216_s28, 16  ;;  %s1725_s24 = smov [#allocation6]  }
 0x477   : > { %p1652_p1 = scmp.ne.s32.totalorder %s1216_s28, %s1651_s14  ;;  %s1655_s21 = sshll.u32 %s1725_s24, 4  ;;  %s1656_s21 = int_to_ptr.vmem [resolvable:$false] %s1655_s21 }
 0x478   : > { %s1657_s27 = scalar_lea.vmem %s1656_s21, 32  ;;  %p1658_p4 = scmp.lt.s32.totalorder %s1216_s28, %s1656_s21 }
 0x479   : > { %p1653_p2 = pnand %p1652_p1, %p1816_p5  ;;  %p1659_p7 = scmp.lt.s32.totalorder %s1657_s27, %s1651_s14 }
 0x47b   : > { %p1654_p3 = pneg %p1653_p2  ;;  %p1660_p8 = por %p1659_p7, %p1658_p4 }
 0x47d   : > { %p1661_p9 = pnand %p1660_p8, %p1654_p3 }
 0x4ff   : > { %v850_v34 = vpop.f32.mrf.mxu1  ;;  %v914_v35 = vpop.f32.mrf.mxu0 }
 0x500   : > { %v857_v36 = vsel %vm856_vm8, %v850_v34, 0.0  ;;  %v920_v37 = vsel %vm856_vm8, %v914_v35, 0.0 }
 0x501   : > { %v858_v38 = vrot.slane %v857_v36, 4  ;;  %v921_v39 = vrot.slane %v920_v37, 4  ;;  %v1497_v40 = vpop.f32.mrf.mxu1  ;;  %v1503_v41 = vpop.f32.mrf.mxu0 }
 0x503   : > { %v859_v42 = vadd.f32 %v858_v38, %v857_v36  ;;  %v922_v43 = vadd.f32 %v921_v39, %v920_v37  ;;  %v853_v44 = vpop.f32.mrf.mxu1  ;;  %v917_v45 = vpop.f32.mrf.mxu0 }
 0x505   : > { %v860_v46 = vrot.slane %v859_v42, 2  ;;  %v923_v47 = vrot.slane %v922_v43, 2  ;;  %v1498_v48 = vpop.f32.mrf.mxu1  ;;  %v1504_v49 = vpop.f32.mrf.mxu0 }
 0x507   : > { %v861_v50 = vadd.f32 %v860_v46, %v859_v42  ;;  %v924_v51 = vadd.f32 %v923_v47, %v922_v43  ;;  %v984_v52 = vpop.f32.mrf.mxu1  ;;  %v1054_v53 = vpop.f32.mrf.mxu0 }
 0x508   : > { %v990_v54 = vsel %vm856_vm8, %v984_v52, 0.0  ;;  %v1060_v55 = vsel %vm856_vm8, %v1054_v53, 0.0 }
 0x509   : > { %v925_v56 = vrot.slane %v924_v51, 1  ;;  %v991_v57 = vrot.slane %v990_v54, 4  ;;  %v1061_v58 = vrot.slane %v1060_v55, 4  ;;  %v1509_v59 = vpop.f32.mrf.mxu1  ;;  %v1515_v60 = vpop.f32.mrf.mxu0  ;;  %v862_v61 = vrot.slane %v861_v50, 1 }
 0x50a   : > { %v1160_v60 = vrot.slane %v2039_v5, 5 }
 0x50b   : > { %v926_v62 = vadd.f32 %v925_v56, %v924_v51  ;;  %v992_v63 = vadd.f32 %v991_v57, %v990_v54  ;;  %v1062_v1 = vadd.f32 %v1061_v58, %v1060_v55  ;;  %v987_v3 = vpop.f32.mrf.mxu1  ;;  %v1057_v4 = vpop.f32.mrf.mxu0  ;;  %v863_v8 = vadd.f32 %v862_v61, %v861_v50 }
 0x50d   : > { %v1510_v6 = vpop.f32.mrf.mxu1  ;;  %v1516_v7 = vpop.f32.mrf.mxu0  ;;  %v993_v9 = vrot.slane %v992_v63, 2  ;;  %v1063_v10 = vrot.slane %v1062_v1, 2  ;;  %vm935_vm10 = vcmp.eq.f32.partialorder %v926_v62, 0.0  ;;  %v865_v17 = vand.u32 2147483647, %v863_v8 }
 0x50e   : > { %vm936_vm11 = vmand %vm935_vm10, %vm864_vm9  ;;  %v927_v20 = vand.u32 2147483647, %v926_v62  ;;  %vm868_vm12 = vcmp.lt.f32.partialorder %v863_v8, 0.0  ;;  %vm933_vm13 = vcmp.lt.f32.partialorder %v926_v62, 0.0  ;;  %vm869_vm3 = vcmp.eq.f32.partialorder %v863_v8, 0.0 }
 0x50f   : > { %v1124_v11 = vpop.f32.mrf.mxu1  ;;  %v994_v12 = vadd.f32 %v993_v9, %v992_v63  ;;  %v1064_v13 = vadd.f32 %v1063_v10, %v1062_v1  ;;  %v937_v25 = vsel %vm936_vm11, 1, %v1720_v2  ;;  %v866_v28 = vadd.f32 %v865_v17, %v2039_v5  ;;  %vm934_vm0 = vmxor %vm868_vm12, %vm933_vm13 }
 0x510   : > { %v1130_v14 = vsel %vm856_vm8, %v1124_v11, 0.0  ;;  %v928_v30 = vadd.f32 %v927_v20, %v2039_v5  ;;  %v938_v32 = vrot.slane %v937_v25, 1  ;;  %vm2057_vm8 = vmand %vm869_vm3, %vm864_vm9 }
 0x511   : > { %v1131_v15 = vrot.slane %v1130_v14, 4  ;;  %v1521_v16 = vpop.f32.mrf.mxu1  ;;  %v995_v18 = vrot.slane %v994_v12, 1  ;;  %v1065_v19 = vrot.slane %v1064_v13, 1  ;;  %v867_v36 = vmin.f32 %v866_v28, 1e+30 }
 0x512   : > { %v930_v38 = vrot.slane %v928_v30, 1  ;;  %vm2061_vm10 = vcmp.ne.s32.totalorder %v938_v32, 0 }
 0x513   : > { %v1132_v21 = vadd.f32 %v1131_v15, %v1130_v14  ;;  %v1127_v22 = vpop.f32.mrf.mxu1  ;;  %v996_v23 = vadd.f32 %v995_v18, %v994_v12  ;;  %v1066_v24 = vadd.f32 %v1065_v19, %v1064_v13 }
 0x514   : > { %v932_v47 = vmin.f32 %v867_v36, %v930_v38 }
 0x515   : > { %v1133_v26 = vrot.slane %v1132_v21, 2  ;;  %v1522_v27 = vpop.f32.mrf.mxu1  ;;  %v997_v29 = vand.u32 2147483647, %v996_v23  ;;  %vm1003_vm14 = vcmp.lt.f32.partialorder %v996_v23, 0.0  ;;  %vm1005_vm15 = vcmp.eq.f32.partialorder %v996_v23, 0.0 }
 0x516   : > { %vm1075_vm1 = vcmp.eq.f32.partialorder %v1066_v24, 0.0  ;;  %vm1006_vm2 = vmand %vm1005_vm15, %vm864_vm9  ;;  %vm1073_vm6 = vcmp.lt.f32.partialorder %v1066_v24, 0.0  ;;  %v1067_v39 = vand.u32 2147483647, %v1066_v24 }
 0x517   : > { %v1134_v31 = vadd.f32 %v1133_v26, %v1132_v21  ;;  %v998_v33 = vadd.f32 %v997_v29, %v2039_v5  ;;  %vm1004_vm5 = vmxor %vm934_vm0, %vm1003_vm14  ;;  %v1007_v34 = vsel %vm1006_vm2, 1, %v1720_v2 }
 0x518   : > { %v1008_v37 = vrot.slane %v1007_v34, 2  ;;  %vm1076_vm7 = vmand %vm1075_vm1, %vm864_vm9  ;;  %v1068_v48 = vadd.f32 %v1067_v39, %v2039_v5 }
 0x519   : > { %v1135_v35 = vrot.slane %v1134_v31, 1  ;;  %v1077_v40 = vsel %vm1076_vm7, 1, %v1720_v2  ;;  %v1000_v44 = vrot.slane %v998_v33, 2  ;;  %vm1074_vm11 = vmxor %vm1004_vm5, %vm1073_vm6 }
 0x51a   : > { %v1078_v45 = vrot.slane %v1077_v40, 3  ;;  %vm1009_vm14 = vcmp.ne.s32.totalorder %v1008_v37, 0  ;;  %vm940_vm0 = vmor %vm2057_vm8, %vm2061_vm10  ;;  %v1070_v55 = vrot.slane %v1068_v48, 3 }
 0x51b   : > { %v1136_v41 = vadd.f32 %v1135_v35, %v1134_v31  ;;  %v1002_v51 = vmin.f32 %v932_v47, %v1000_v44  ;;  %vm1010_vm2 = vmor %vm940_vm0, %vm1009_vm14 }
 0x51c   : > { %vm1079_vm3 = vcmp.ne.s32.totalorder %v1078_v45, 0 }
 0x51d   : > { %v1137_v46 = vand.u32 2147483647, %v1136_v41  ;;  %vm1143_vm12 = vcmp.lt.f32.partialorder %v1136_v41, 0.0  ;;  %vm1145_vm13 = vcmp.eq.f32.partialorder %v1136_v41, 0.0  ;;  %vm1080_vm5 = vmor %vm1010_vm2, %vm1079_vm3  ;;  %v1072_v57 = vmin.f32 %v1002_v51, %v1070_v55 }
 0x51e   : > { %vm1144_vm15 = vmxor %vm1074_vm11, %vm1143_vm12 }
 0x51f   : > { %v1138_v49 = vadd.f32 %v1137_v46, %v2039_v5  ;;  %v1390_v50 = vsel %vm1144_vm15, 1.0, %v1717_v0  ;;  %vm1146_vm1 = vmand %vm1145_vm13, %vm864_vm9 }
 0x520   : > { %v1147_v52 = vsel %vm1146_vm1, 1, %v1720_v2  ;;  %v1155_v54 = vmul.f32 2.0, %v1390_v50 }
 0x521   : > { %v1148_v53 = vrot.slane %v1147_v52, 4  ;;  %v1140_v56 = vrot.slane %v1138_v49, 4 }
 0x522   : > { %v1156_v0 = vsub.f32 1.0, %v1155_v54 }
 0x523   : > { %vm1149_vm6 = vcmp.ne.s32.totalorder %v1148_v53, 0  ;;  %v1142_v59 = vmin.f32 %v1072_v57, %v1140_v56 }
 0x524   : > { %vm1150_vm7 = vmor %vm1080_vm5, %vm1149_vm6 }
 0x525   : > { %v1151_v58 = vsel %vm1150_vm7, 1, %v1720_v2 }
 0x526   : > { %vm1152_vm9 = vcmp.gt.s32.totalorder %v1151_v58, 0 }
 0x527   : > { %v1157_v61 = vsel %vm1152_vm9, 0.0, %v1156_v0 }
 0x528   : > { %v1158_v62 = vmul.f32 %v1157_v61, %v1142_v59 }
 0x52a   : > { %v1162_v63 = vmul.f32 %v1160_v60, %v1158_v62 }
 0x52c   : > { %1163 = vst.msk [vmem:[%s341_s22] sm:$0x1] %vm790_vm4, %v1162_v63 }
 0x52d   : > { %1664 = shalt.err (!%p1661_p9)
}
 0x52e   : > { %s1665_s13 = scalar_lea.hbm %s1213_s1, 16  ;;  %s1669_s23 = scalar_lea.hbm %s2125_s9, 32 }
 0x52f   : > { %p1666_p10 = scmp.ne.s32.totalorder %s1213_s1, %s1665_s13  ;;  %p1670_p13 = scmp.lt.s32.totalorder %s1213_s1, %s2125_s9 }
 0x530   : > { %p1671_p0 = scmp.lt.s32.totalorder %s1669_s23, %s1665_s13 }
 0x531   : > { %p1667_p11 = pnand %p1666_p10, %p1816_p5 }
 0x532   : > { %p1672_p1 = por %p1671_p0, %p1670_p13 }
 0x533   : > { %p1668_p12 = pneg %p1667_p11 }
 0x535   : > { %p1673_p2 = pnand %p1672_p1, %p1668_p12 }
 0x537   : > { %1676 = shalt.err (!%p1673_p2)
}
 0x538   : > { %1525 = dma.vmem_to_hbm [thread:$0]  (%p1816_p5), %s1216_s28, 16, %s1213_s1, %s1984_s16  }
 0x539 PF: > { %p1539_p3 = scmp.ge.s32.totalorder %s1715_s12, 2  ;;  %s1227_s29 = sand.u32 1, %s1703_s30  }
 0x53a   : > { %s1228_s0 = scalar_lea.sflag [#allocation3], %s1227_s29 }
 0x53b   : > { %p1530_p4 = pnand %p1539_p3, %p1820_p6 }
 0x53d   : > { %p1531_p7 = pneg %p1530_p4 }
 0x53f   : > { %1694 = dma.done.wait (%p1531_p7), %s1228_s0, 256  }
 0x540   : > { %1696 = vsyncadd (%p1531_p7), %s1228_s0, 4294967040  ;;  %s2139_s14 = sadd.s32 4294967294, %s1715_s12  }
 0x541   : > { %s1236_s24 = sand.u32 1, %s2139_s14  }
 0x542   : > { %s1237_s21 = scalar_lea.sflag [#allocation5], %s1236_s24 }
 0x543   : > { %1698 = dma.done.wait (%p1531_p7), %s1237_s21, 32  }
 0x544   : > { %1700 = vsyncadd (%p1531_p7), %s1237_s21, 4294967264  ;;  %p23_p5 = scmp.ge.s32.totalorder %s1801_s15, 4   ;;  %s2140_s30 = smov %s1707_s10 }
 0x545   : > { %s2141_s10 = smov %s1711_s11  ;;  %s2142_s11 = smov %s1814_s18 }
 0x546   : > { %s2143_s12 = smov %s1801_s15  ;;  %25 = sbr.rel (!%p23_p5) target bundleno = 8 (0x8), region = 122 }
 0x54b   :  { %1249 = vsyncpa [#allocation3], 1 }
 0x54c   :  { %1251 = vsyncpa [#allocation3 + $0x1], 1 }
 0x54d   :  { %1252 = vsyncpa [#allocation5], 1 }
 0x54e   :  { %1254 = vsyncpa [#allocation5 + $0x1], 1 }

</bundles_post_ra>
